<compile_context>
chip_gen: v6e
topology: v6e:2x2x1
jax: 0.10.0
libtpu: 0.0.40
codegen_flags: <defaults>
</compile_context>

<pallas_src>
import functools

import jax
import jax.numpy as jnp
from jax import lax
from jax.experimental import pallas as pl
from jax.experimental.pallas import tpu as pltpu


# ---------------------------------------------------------------------------
# Fused kernel: one (TILE_B, *) row-block per grid step, all in VMEM.
# fc1 -> ReLU -> (fc2 with depthwise conv pre-folded into its weights/bias).
# ---------------------------------------------------------------------------

def ff_ea2_kernel(x_ref, w1_ref, b1_ref, w2f_ref, b2f_ref, o_ref):
    h = jnp.dot(x_ref[...], w1_ref[...],
                preferred_element_type=jnp.float32) + b1_ref[...]
    h = jnp.maximum(h, 0.0)                                    # ReLU
    o_ref[...] = (jnp.dot(h, w2f_ref[...],
                          preferred_element_type=jnp.float32)
                  + b2f_ref[...])


# ---------------------------------------------------------------------------
# Wrapper: conv-into-fc2 folding + batch tiling + single pallas_call.
# ---------------------------------------------------------------------------

def ff_ea2_forward(x, params, *, channels, height, width, tile_b=256):
    B = x.shape[0]
    hidden = params["w1"].shape[0]
    in_ch = params["w1"].shape[1]
    out_ch = params["w2"].shape[0]
    hw = height * width
    assert out_ch == channels * hw

    # --- flatten input rows --------------------------------------------------
    x_flat = x.reshape(B, -1).astype(jnp.float32)              # (B, in_ch)
    assert x_flat.shape[1] == in_ch

    # --- batch tile sizing (sublane-aligned when tiling, pad ragged batch) ---
    tile_b = max(1, min(tile_b, B))
    if tile_b < B:
        tile_b = max(8, (tile_b // 8) * 8)
    pad = (-B) % tile_b
    if pad:
        x_flat = jnp.pad(x_flat, ((0, pad), (0, 0)))
    Bp = B + pad
    grid = (Bp // tile_b,)

    # --- fc1 weights, pre-transposed to (in, out) ----------------------------
    w1t = params["w1"].T.astype(jnp.float32)                   # (in_ch, hidden)
    b1 = params["b1"].reshape(1, hidden).astype(jnp.float32)

    # --- fold depthwise 3x3 conv into fc2 (exact: conv is linear in y) -------
    # Flat index f = c*H*W + i*W + j.  For tap offset (oi, oj):
    #   conv(y)[f] = conv_bias[f] + sum_t tap[t, f] * y[f + oi*W + oj]
    # with tap zeroed where (i+oi, j+oj) falls outside the image, so the
    # circular jnp.roll wrap-around is multiplied by zero and never observed.
    w2t = params["w2"].T.astype(jnp.float32)                   # (hidden, out_ch)
    b2 = params["b2"].astype(jnp.float32)                      # (out_ch,)
    f = jnp.arange(out_ch)
    c = f // hw
    i = (f // width) % height
    j = f % width
    kdw = params["w_dw"].reshape(channels, 3, 3).astype(jnp.float32)

    w2_fold = jnp.zeros_like(w2t)
    b2_fold = params["b_dw"].astype(jnp.float32)[c]            # conv bias / lane
    for t in range(9):                                         # trace-time only
        oi, oj = t // 3 - 1, t % 3 - 1
        d = oi * width + oj
        valid = ((i + oi >= 0) & (i + oi < height) &
                 (j + oj >= 0) & (j + oj < width))
        tap = jnp.where(valid, kdw[c, oi + 1, oj + 1], 0.0)    # (out_ch,)
        w2_fold = w2_fold + tap[None, :] * jnp.roll(w2t, -d, axis=-1)
        b2_fold = b2_fold + tap * jnp.roll(b2, -d)
    b2_fold = b2_fold.reshape(1, out_ch)

    out = pl.pallas_call(
        ff_ea2_kernel,
        out_shape=jax.ShapeDtypeStruct((Bp, out_ch), jnp.float32),
        grid=grid,
        in_specs=[
            pl.BlockSpec((tile_b, in_ch), lambda b: (b, 0)),
            pl.BlockSpec((in_ch, hidden), lambda b: (0, 0)),
            pl.BlockSpec((1, hidden), lambda b: (0, 0)),
            pl.BlockSpec((hidden, out_ch), lambda b: (0, 0)),
            pl.BlockSpec((1, out_ch), lambda b: (0, 0)),
        ],
        out_specs=pl.BlockSpec((tile_b, out_ch), lambda b: (b, 0)),
        compiler_params=pltpu.CompilerParams(
            dimension_semantics=("parallel",)),
    )(x_flat, w1t, b1, w2_fold, b2_fold)

    return out[:B].reshape(B, channels, height, width)


# ---------------------------------------------------------------------------
# Pure-JAX reference + deterministic synthetic parameters
# ---------------------------------------------------------------------------

def reference_forward(x, params, channels, height, width):
    B = x.shape[0]
    xf = x.reshape(B, -1).astype(jnp.float32)
    h = jnp.maximum(
        jnp.dot(xf, params["w1"].T, precision=lax.Precision.HIGHEST)
        + params["b1"], 0.0)
    y = (jnp.dot(h, params["w2"].T, precision=lax.Precision.HIGHEST)
         + params["b2"])
    img = y.reshape(B, channels, height, width)
    out = lax.conv_general_dilated(
        img, params["w_dw"], window_strides=(1, 1), padding=((1, 1), (1, 1)),
        dimension_numbers=("NCHW", "OIHW", "NCHW"),
        feature_group_count=channels, precision=lax.Precision.HIGHEST)
    return out + params["b_dw"].reshape(1, channels, 1, 1)


def make_params(key, in_channels, hidden_size, out_channels):
    ks = jax.random.split(key, 6)

    def nrm(k, shape, std):
        return std * jax.random.normal(k, shape, jnp.float32)

    return dict(
        w1=nrm(ks[0], (hidden_size, in_channels), 0.05),   # torch (out, in)
        b1=nrm(ks[1], (hidden_size,), 0.05),
        w2=nrm(ks[2], (out_channels, hidden_size), 0.05),
        b2=nrm(ks[3], (out_channels,), 0.05),
        w_dw=nrm(ks[4], (in_channels, 1, 3, 3), 0.5),       # depthwise (C,1,3,3)
        b_dw=nrm(ks[5], (in_channels,), 0.5),
    )


if __name__ == "__main__":
    B = 8
    in_channels = 16                       # fc1 in_features == conv channels C
    hidden_size = 64
    height = width = 8
    out_channels = in_channels * height * width   # 1024 -> view (B, C, H, W) valid

    key = jax.random.PRNGKey(0)
    kx, kp = jax.random.split(key)
    x = jax.random.normal(kx, (B, 4, 2, 2), jnp.float32)   # flattens to 16 feats
    params = make_params(kp, in_channels, hidden_size, out_channels)

    fwd = jax.jit(functools.partial(ff_ea2_forward, channels=in_channels,
                                    height=height, width=width))
    out = fwd(x, params)
    jax.block_until_ready(out)

    ref = reference_forward(x, params, in_channels, height, width)
    assert out.shape == (B, in_channels, height, width)
    assert bool(jnp.all(jnp.isfinite(out)))
    max_err = float(jnp.max(jnp.abs(out - ref)))
    assert bool(jnp.allclose(out, ref, rtol=2e-2, atol=2e-2)), max_err
    print("KERNEL_OK")
</pallas_src>

<mosaic_0001>
module attributes {stable_mosaic.version = 11 : i64} {
  func.func @ff_ea2_kernel(%arg0: i32, %arg1: memref<8x16xf32, #tpu.memory_space<vmem>>, %arg2: memref<16x64xf32, #tpu.memory_space<vmem>>, %arg3: memref<1x64xf32, #tpu.memory_space<vmem>>, %arg4: memref<64x1024xf32, #tpu.memory_space<vmem>>, %arg5: memref<1x1024xf32, #tpu.memory_space<vmem>>, %arg6: memref<8x1024xf32, #tpu.memory_space<vmem>>) attributes {dimension_semantics = [#tpu.dimension_semantics<parallel>], iteration_bounds = array<i64: 1>, scalar_prefetch = 0 : i64, scratch_operands = 0 : i64, tpu.core_type = #tpu.core_type<tc>, window_params = [{transform_indices = @transform_0, window_bounds = array<i64: 8, 16>}, {pipeline_mode = #tpu.pipeline_mode<synchronous>, transform_indices = @transform_1, window_bounds = array<i64: 16, 64>}, {pipeline_mode = #tpu.pipeline_mode<synchronous>, transform_indices = @transform_2, window_bounds = array<i64: 1, 64>}, {pipeline_mode = #tpu.pipeline_mode<synchronous>, transform_indices = @transform_3, window_bounds = array<i64: 64, 1024>}, {pipeline_mode = #tpu.pipeline_mode<synchronous>, transform_indices = @transform_4, window_bounds = array<i64: 1, 1024>}, {transform_indices = @transform_5, window_bounds = array<i64: 8, 1024>}]} {
    %c0 = arith.constant 0 : index
    %c0_0 = arith.constant 0 : index
    %0 = vector.load %arg1[%c0, %c0_0] : memref<8x16xf32, #tpu.memory_space<vmem>>, vector<8x16xf32>
    %c0_1 = arith.constant 0 : index
    %c0_2 = arith.constant 0 : index
    %1 = vector.load %arg2[%c0_1, %c0_2] : memref<16x64xf32, #tpu.memory_space<vmem>>, vector<16x64xf32>
    %cst = arith.constant dense<0.000000e+00> : vector<8x64xf32>
    %2 = tpu.matmul %0, %1, %cst {dimension_numbers = #tpu.dot_dimension_numbers<[1], [0], [0], [1], [0, 0, 1, 1], [], []>} : vector<8x16xf32>, vector<16x64xf32>, vector<8x64xf32> -> vector<8x64xf32>
    %c0_3 = arith.constant 0 : index
    %c0_4 = arith.constant 0 : index
    %3 = vector.load %arg3[%c0_3, %c0_4] : memref<1x64xf32, #tpu.memory_space<vmem>>, vector<1x64xf32>
    %4 = vector.broadcast %3 : vector<1x64xf32> to vector<8x64xf32>
    %5 = arith.addf %2, %4 : vector<8x64xf32>
    %cst_5 = arith.constant 0.000000e+00 : f32
    %6 = vector.broadcast %cst_5 : f32 to vector<8x64xf32>
    %7 = arith.maximumf %5, %6 : vector<8x64xf32>
    %c0_6 = arith.constant 0 : index
    %c0_7 = arith.constant 0 : index
    %8 = vector.load %arg4[%c0_6, %c0_7] : memref<64x1024xf32, #tpu.memory_space<vmem>>, vector<64x1024xf32>
    %cst_8 = arith.constant dense<0.000000e+00> : vector<8x1024xf32>
    %9 = tpu.matmul %7, %8, %cst_8 {dimension_numbers = #tpu.dot_dimension_numbers<[1], [0], [0], [1], [0, 0, 1, 1], [], []>} : vector<8x64xf32>, vector<64x1024xf32>, vector<8x1024xf32> -> vector<8x1024xf32>
    %c0_9 = arith.constant 0 : index
    %c0_10 = arith.constant 0 : index
    %10 = vector.load %arg5[%c0_9, %c0_10] : memref<1x1024xf32, #tpu.memory_space<vmem>>, vector<1x1024xf32>
    %11 = vector.broadcast %10 : vector<1x1024xf32> to vector<8x1024xf32>
    %12 = arith.addf %9, %11 : vector<8x1024xf32>
    %c0_11 = arith.constant 0 : index
    %c0_12 = arith.constant 0 : index
    %13 = vector.load %arg6[%c0_11, %c0_12] : memref<8x1024xf32, #tpu.memory_space<vmem>>, vector<8x1024xf32>
    tpu.vector_store %arg6[%c0_11, %c0_12], %12 {strides = array<i32>} : memref<8x1024xf32, #tpu.memory_space<vmem>>, vector<8x1024xf32>,
    return
  }
  func.func @transform_0(%arg0: i32) -> (i32, i32) {
    %c0_i32 = arith.constant 0 : i32
    %c0_i32_0 = arith.constant 0 : i32
    return %arg0, %c0_i32 : i32, i32
  }
  func.func @transform_1(%arg0: i32) -> (i32, i32) {
    %c0_i32 = arith.constant 0 : i32
    %c0_i32_0 = arith.constant 0 : i32
    %c0_i32_1 = arith.constant 0 : i32
    return %c0_i32, %c0_i32_0 : i32, i32
  }
  func.func @transform_2(%arg0: i32) -> (i32, i32) {
    %c0_i32 = arith.constant 0 : i32
    %c0_i32_0 = arith.constant 0 : i32
    %c0_i32_1 = arith.constant 0 : i32
    return %c0_i32, %c0_i32_0 : i32, i32
  }
  func.func @transform_3(%arg0: i32) -> (i32, i32) {
    %c0_i32 = arith.constant 0 : i32
    %c0_i32_0 = arith.constant 0 : i32
    %c0_i32_1 = arith.constant 0 : i32
    return %c0_i32, %c0_i32_0 : i32, i32
  }
  func.func @transform_4(%arg0: i32) -> (i32, i32) {
    %c0_i32 = arith.constant 0 : i32
    %c0_i32_0 = arith.constant 0 : i32
    %c0_i32_1 = arith.constant 0 : i32
    return %c0_i32, %c0_i32_0 : i32, i32
  }
  func.func @transform_5(%arg0: i32) -> (i32, i32) {
    %c0_i32 = arith.constant 0 : i32
    %c0_i32_0 = arith.constant 0 : i32
    return %arg0, %c0_i32 : i32, i32
  }
}

</mosaic_0001>

<bundles_post_ra>
// kernel: ff_ea2_forward.1
= control target key start
LH: loop header
LB: loop body
LE: loop exit
PB: predicated region body
PF: predicated region fallthrough
CT: control target
= control target key end

     0   :  { %v529_v0 = vmov 0.0   ;;  %vm530_vm0 = vmmov 0   ;;  %vm30_vm1 = vcmask 130048   ;;  %vm211_vm2 = vcmask 523264   ;;  %s809_s1 = inlined_call_operand.vmem [shape: f32[16,64], index: 1, kind: input, shape index: {}]   ;;  %s810_s0 = inlined_call_operand.vmem [shape: f32[8,16], index: 0, kind: input, shape index: {}]   ;;  %s811_s3 = inlined_call_operand.vmem [shape: f32[64,1024], index: 3, kind: input, shape index: {}]   ;;  %s812_s2 = inlined_call_operand.vmem [shape: f32[1,64], index: 2, kind: input, shape index: {}]   ;;  %s813_s4 = inlined_call_operand.vmem [shape: f32[1,1024], index: 4, kind: input, shape index: {}]   ;;  %s814_s5 = inlined_call_operand.vmem [shape: f32[8,1024], index: 5, kind: output, shape index: {}]  }
   0x1   :  { %520 = vmatprep.subr.mxu0 %v529_v0  ;;  %v22_v1 = vld [vmem:[%s809_s1 + $0x8] sm:$0xff]  ;;  %v21_v2 = vld [vmem:[%s809_s1] sm:$0xff]  ;;  %524 = vmatprep.mubr.msk.f32.mxu0 %vm530_vm0, %v529_v0  ;;  %v164_v5 = vld [vmem:[%s811_s3 + $0x1d8] sm:$0xff] }
   0x2   :  { %v20_v3 = vld [vmem:[%s810_s0] sm:$0xff]  ;;  %521 = vmatpush3.msra.mxu0 %v22_v1  ;;  %v162_v4 = vld [vmem:[%s811_s3 + $0x1c8] sm:$0xff]  ;;  %279 = vmatprep.mubr.f32.mxu1 %v529_v0  ;;  %v163_v7 = vld [vmem:[%s811_s3 + $0x1d0] sm:$0xff] }
   0x3   :  { %v161_v6 = vld [vmem:[%s811_s3 + $0x1c0] sm:$0xff]  ;;  %522 = vmatprep.subr.mxu0 %v529_v0  ;;  %231 = vmatprep.subr.mxu1 %v162_v4  ;;  %v154_v8 = vld [vmem:[%s811_s3 + $0x188] sm:$0xff]  ;;  %v156_v9 = vld [vmem:[%s811_s3 + $0x198] sm:$0xff] }
   0x4   :  { %523 = vmatpush3.msra.mxu0 %v21_v2  ;;  %232 = vmatpush1.msra.mxu1 %v161_v6  ;;  %v153_v10 = vld [vmem:[%s811_s3 + $0x180] sm:$0xff]  ;;  %v155_v11 = vld [vmem:[%s811_s3 + $0x190] sm:$0xff]  ;;  %v146_v12 = vld [vmem:[%s811_s3 + $0x148] sm:$0xff] }
   0x5   :  { %525 = vmatmul.mubr.msk.f32.vlgmr.msra.gmra.mxu0 %vm30_vm1, %v20_v3  ;;  %302 = vmatprep.subr.mxu0 %v164_v5  ;;  %v148_v13 = vld [vmem:[%s811_s3 + $0x158] sm:$0xff]  ;;  %v145_v14 = vld [vmem:[%s811_s3 + $0x140] sm:$0xff]  ;;  %v147_v15 = vld [vmem:[%s811_s3 + $0x150] sm:$0xff] }
   0x6   :  { %303 = vmatpush1.msra.mxu0 %v163_v7  ;;  %233 = vmatprep.subr.mxu1 %v154_v8  ;;  %v138_v16 = vld [vmem:[%s811_s3 + $0x108] sm:$0xff]  ;;  %v140_v17 = vld [vmem:[%s811_s3 + $0x118] sm:$0xff]  ;;  %v137_v18 = vld [vmem:[%s811_s3 + $0x100] sm:$0xff] }
   0x7   :  { %304 = vmatprep.subr.mxu0 %v156_v9  ;;  %234 = vmatpush1.msra.mxu1 %v153_v10  ;;  %v139_v19 = vld [vmem:[%s811_s3 + $0x110] sm:$0xff]  ;;  %v130_v20 = vld [vmem:[%s811_s3 + $0xc8] sm:$0xff]  ;;  %v132_v21 = vld [vmem:[%s811_s3 + $0xd8] sm:$0xff]  ;;  %v171_v10 = vlaneseq }
   0x8   :  { %305 = vmatpush1.msra.mxu0 %v155_v11  ;;  %235 = vmatprep.subr.mxu1 %v146_v12  ;;  %v129_v22 = vld [vmem:[%s811_s3 + $0xc0] sm:$0xff]  ;;  %v131_v23 = vld [vmem:[%s811_s3 + $0xd0] sm:$0xff]  ;;  %v122_v24 = vld [vmem:[%s811_s3 + $0x88] sm:$0xff] }
   0x9   :  { %306 = vmatprep.subr.mxu0 %v148_v13  ;;  %236 = vmatpush1.msra.mxu1 %v145_v14  ;;  %v124_v25 = vld [vmem:[%s811_s3 + $0x98] sm:$0xff]  ;;  %v121_v26 = vld [vmem:[%s811_s3 + $0x80] sm:$0xff]  ;;  %v123_v27 = vld [vmem:[%s811_s3 + $0x90] sm:$0xff]  ;;  %v172_v11 = vshrl.u32 %v171_v10, 7 }
   0xa   :  { %307 = vmatpush1.msra.mxu0 %v147_v15  ;;  %237 = vmatprep.subr.mxu1 %v138_v16  ;;  %v114_v28 = vld [vmem:[%s811_s3 + $0x48] sm:$0xff]  ;;  %v116_v29 = vld [vmem:[%s811_s3 + $0x58] sm:$0xff]  ;;  %v113_v30 = vld [vmem:[%s811_s3 + $0x40] sm:$0xff] }
   0xb   :  { %308 = vmatprep.subr.mxu0 %v140_v17  ;;  %238 = vmatpush1.msra.mxu1 %v137_v18  ;;  %v115_v31 = vld [vmem:[%s811_s3 + $0x50] sm:$0xff]  ;;  %v106_v32 = vld [vmem:[%s811_s3 + $0x8] sm:$0xff]  ;;  %v108_v33 = vld [vmem:[%s811_s3 + $0x18] sm:$0xff]  ;;  %v173_v12 = vsub.s32 0, %v172_v11  ;;  %v181_v13 = vsub.s32 2, %v172_v11  ;;  %v177_v15 = vsub.s32 1, %v172_v11 }
   0xc   :  { %309 = vmatpush1.msra.mxu0 %v139_v19  ;;  %239 = vmatprep.subr.mxu1 %v130_v20  ;;  %v105_v34 = vld [vmem:[%s811_s3] sm:$0xff]  ;;  %v107_v35 = vld [vmem:[%s811_s3 + $0x10] sm:$0xff]  ;;  %v166_v36 = vld [vmem:[%s811_s3 + $0x1e8] sm:$0xff]  ;;  %v185_v16 = vsub.s32 3, %v172_v11 }
   0xd   :  { %310 = vmatprep.subr.mxu0 %v132_v21  ;;  %240 = vmatpush1.msra.mxu1 %v129_v22  ;;  %v168_v37 = vld [vmem:[%s811_s3 + $0x1f8] sm:$0xff]  ;;  %v511_v38 = vld [vmem:[%s812_s2] ss:$0 sm:$0xff]  ;;  %v167_v44 = vld [vmem:[%s811_s3 + $0x1f0] sm:$0xff] }
   0xe   :  { %311 = vmatpush1.msra.mxu0 %v131_v23  ;;  %241 = vmatprep.subr.mxu1 %v122_v24  ;;  %v165_v43 = vld [vmem:[%s811_s3 + $0x1e0] sm:$0xff]  ;;  %v158_v45 = vld [vmem:[%s811_s3 + $0x1a8] sm:$0xff]  ;;  %v160_v46 = vld [vmem:[%s811_s3 + $0x1b8] sm:$0xff] }
   0xf   :  { %312 = vmatprep.subr.mxu0 %v124_v25  ;;  %242 = vmatpush1.msra.mxu1 %v121_v26  ;;  %v157_v47 = vld [vmem:[%s811_s3 + $0x1a0] sm:$0xff]  ;;  %v159_v48 = vld [vmem:[%s811_s3 + $0x1b0] sm:$0xff]  ;;  %v150_v49 = vld [vmem:[%s811_s3 + $0x168] sm:$0xff] }
  0x10   :  { %313 = vmatpush1.msra.mxu0 %v123_v27  ;;  %350 = vmatprep.mubr.f32.mxu0 %v529_v0  ;;  %v152_v50 = vld [vmem:[%s811_s3 + $0x178] sm:$0xff]  ;;  %v149_v51 = vld [vmem:[%s811_s3 + $0x160] sm:$0xff]  ;;  %v151_v52 = vld [vmem:[%s811_s3 + $0x170] sm:$0xff] }
  0x11   :  { %243 = vmatprep.subr.mxu1 %v114_v28  ;;  %314 = vmatprep.subr.mxu0 %v116_v29  ;;  %v142_v53 = vld [vmem:[%s811_s3 + $0x128] sm:$0xff]  ;;  %v144_v54 = vld [vmem:[%s811_s3 + $0x138] sm:$0xff]  ;;  %v141_v55 = vld [vmem:[%s811_s3 + $0x120] sm:$0xff]  ;;  %v189_v28 = vsub.s32 4, %v172_v11  ;;  %v197_v29 = vsub.s32 6, %v172_v11 }
  0x12   :  { %244 = vmatpush1.msra.mxu1 %v113_v30  ;;  %315 = vmatpush1.msra.mxu0 %v115_v31  ;;  %v143_v56 = vld [vmem:[%s811_s3 + $0x130] sm:$0xff]  ;;  %v134_v57 = vld [vmem:[%s811_s3 + $0xe8] sm:$0xff]  ;;  %v136_v58 = vld [vmem:[%s811_s3 + $0xf8] sm:$0xff]  ;;  %v193_v30 = vsub.s32 5, %v172_v11  ;;  %v201_v31 = vsub.s32 7, %v172_v11 }
  0x13   :  { %245 = vmatprep.subr.mxu1 %v106_v32  ;;  %316 = vmatprep.subr.mxu0 %v108_v33  ;;  %v133_v59 = vld [vmem:[%s811_s3 + $0xe0] sm:$0xff]  ;;  %v135_v60 = vld [vmem:[%s811_s3 + $0xf0] sm:$0xff]  ;;  %v126_v61 = vld [vmem:[%s811_s3 + $0xa8] sm:$0xff] }
  0x14   :  { %246 = vmatpush1.msra.mxu1 %v105_v34  ;;  %317 = vmatpush1.msra.mxu0 %v107_v35  ;;  %v128_v62 = vld [vmem:[%s811_s3 + $0xb8] sm:$0xff]  ;;  %v125_v63 = vld [vmem:[%s811_s3 + $0xa0] sm:$0xff]  ;;  %v127_v1 = vld [vmem:[%s811_s3 + $0xb0] sm:$0xff] }
  0x15   :  { %373 = vmatprep.subr.mxu1 %v166_v36  ;;  %444 = vmatprep.subr.mxu0 %v168_v37  ;;  %v118_v2 = vld [vmem:[%s811_s3 + $0x68] sm:$0xff]  ;;  %v120_v3 = vld [vmem:[%s811_s3 + $0x78] sm:$0xff]  ;;  %v117_v4 = vld [vmem:[%s811_s3 + $0x60] sm:$0xff] }
  0x16   :  { %v119_v5 = vld [vmem:[%s811_s3 + $0x70] sm:$0xff]  ;;  %v110_v6 = vld [vmem:[%s811_s3 + $0x28] sm:$0xff]  ;;  %v112_v7 = vld [vmem:[%s811_s3 + $0x38] sm:$0xff] }
  0x17   :  { %v109_v8 = vld [vmem:[%s811_s3 + $0x20] sm:$0xff]  ;;  %v111_v9 = vld [vmem:[%s811_s3 + $0x30] sm:$0xff] }
  0x18   :  { %v169_v14 = vld [vmem:[%s813_s4] sm:$0xff] }
  0x19   :  { %v174_v17 = vrot.slane %v169_v14, %v173_v12  ;;  %v182_v18 = vrot.slane %v169_v14, %v181_v13  ;;  %v178_v19 = vrot.slane %v169_v14, %v177_v15  ;;  %v190_v32 = vrot.slane %v169_v14, %v189_v28 }
  0x1a   :  { %v198_v33 = vrot.slane %v169_v14, %v197_v29  ;;  %v194_v34 = vrot.slane %v169_v14, %v193_v30  ;;  %v202_v35 = vrot.slane %v169_v14, %v201_v31 }
  0xc5   :  { %v100_v39 = vpop.f32.mrf.mxu0 }
  0xc6   :  { %v101_v40 = vadd.f32 %v511_v38, %v100_v39 }
  0xc7   :  { %v526_v41 = vpop.f32.mrf.mxu0 }
  0xc8   :  { %v680_v42 = vmax.f32 %v101_v40, 0.0 }
  0xca   :  { %513 = vmatmul.mubr.msk.f32.vlgmr.msra.gmra.mxu1 %vm211_vm2, %v680_v42  ;;  %514 = vmatmul.mubr.msk.f32.vlgmr.msra.gmra.mxu0 %vm211_vm2, %v680_v42 }
  0xcb   :  { %374 = vmatpush1.msra.mxu1 %v165_v43  ;;  %445 = vmatpush1.msra.mxu0 %v167_v44 }
  0xcc   :  { %375 = vmatprep.subr.mxu1 %v158_v45  ;;  %446 = vmatprep.subr.mxu0 %v160_v46 }
  0xcd   :  { %376 = vmatpush1.msra.mxu1 %v157_v47  ;;  %447 = vmatpush1.msra.mxu0 %v159_v48 }
  0xce   :  { %377 = vmatprep.subr.mxu1 %v150_v49  ;;  %448 = vmatprep.subr.mxu0 %v152_v50 }
  0xcf   :  { %378 = vmatpush1.msra.mxu1 %v149_v51  ;;  %449 = vmatpush1.msra.mxu0 %v151_v52 }
  0xd0   :  { %379 = vmatprep.subr.mxu1 %v142_v53  ;;  %450 = vmatprep.subr.mxu0 %v144_v54 }
  0xd1   :  { %380 = vmatpush1.msra.mxu1 %v141_v55  ;;  %451 = vmatpush1.msra.mxu0 %v143_v56 }
  0xd2   :  { %381 = vmatprep.subr.mxu1 %v134_v57  ;;  %452 = vmatprep.subr.mxu0 %v136_v58 }
  0xd3   :  { %382 = vmatpush1.msra.mxu1 %v133_v59  ;;  %453 = vmatpush1.msra.mxu0 %v135_v60 }
  0xd4   :  { %383 = vmatprep.subr.mxu1 %v126_v61  ;;  %454 = vmatprep.subr.mxu0 %v128_v62 }
  0xd5   :  { %384 = vmatpush1.msra.mxu1 %v125_v63  ;;  %455 = vmatpush1.msra.mxu0 %v127_v1 }
  0xd6   :  { %385 = vmatprep.subr.mxu1 %v118_v2  ;;  %456 = vmatprep.subr.mxu0 %v120_v3 }
  0xd7   :  { %386 = vmatpush1.msra.mxu1 %v117_v4  ;;  %457 = vmatpush1.msra.mxu0 %v119_v5 }
  0xd8   :  { %387 = vmatprep.subr.mxu1 %v110_v6  ;;  %458 = vmatprep.subr.mxu0 %v112_v7 }
  0xd9   :  { %388 = vmatpush1.msra.mxu1 %v109_v8  ;;  %421 = vmatprep.mubr.f32.mxu1 %v529_v0 }
  0xda   :  { %459 = vmatpush1.msra.mxu0 %v111_v9  ;;  %492 = vmatprep.mubr.f32.mxu0 %v529_v0  ;;  %v186_v0 = vrot.slane %v169_v14, %v185_v16 }
  0xdb   :  { %515 = vmatmul.mubr.msk.f32.vlgmr.msra.gmra.mxu1 %vm211_vm2, %v680_v42  ;;  %516 = vmatmul.mubr.msk.f32.vlgmr.msra.gmra.mxu0 %vm211_vm2, %v680_v42 }
 0x18a   :  { %v281_v20 = vpop.f32.mrf.mxu1  ;;  %v352_v21 = vpop.f32.mrf.mxu0 }
 0x18b   :  { %v282_v22 = vadd.f32 %v281_v20, %v174_v17  ;;  %v353_v23 = vadd.f32 %v352_v21, %v182_v18 }
 0x18c   :  { %v283_v24 = vpop.f32.mrf.mxu1  ;;  %v354_v25 = vpop.f32.mrf.mxu0 }
 0x18d   :  { %499 = vst [vmem:[%s814_s5] sm:$0xff] %v282_v22  ;;  %501 = vst [vmem:[%s814_s5 + $0x10] sm:$0xff] %v353_v23  ;;  %v284_v26 = vadd.f32 %v283_v24, %v178_v19  ;;  %v355_v27 = vadd.f32 %v354_v25, %v186_v0 }
 0x18f   :  { %500 = vst [vmem:[%s814_s5 + $0x8] sm:$0xff] %v284_v26  ;;  %502 = vst [vmem:[%s814_s5 + $0x18] sm:$0xff] %v355_v27 }
 0x19b   :  { %v423_v36 = vpop.f32.mrf.mxu1  ;;  %v494_v37 = vpop.f32.mrf.mxu0 }
 0x19c   :  { %v424_v38 = vadd.f32 %v423_v36, %v190_v32  ;;  %v495_v39 = vadd.f32 %v494_v37, %v198_v33 }
 0x19d   :  { %v425_v40 = vpop.f32.mrf.mxu1  ;;  %v496_v41 = vpop.f32.mrf.mxu0 }
 0x19e   :  { %503 = vst [vmem:[%s814_s5 + $0x20] sm:$0xff] %v424_v38  ;;  %505 = vst [vmem:[%s814_s5 + $0x30] sm:$0xff] %v495_v39  ;;  %v426_v42 = vadd.f32 %v425_v40, %v194_v34  ;;  %v497_v43 = vadd.f32 %v496_v41, %v202_v35 }
 0x1a0   :  { %504 = vst [vmem:[%s814_s5 + $0x28] sm:$0xff] %v426_v42  ;;  %506 = vst [vmem:[%s814_s5 + $0x38] sm:$0xff] %v497_v43 }

</bundles_post_ra>
